<compile_context>
chip_gen: v7x
topology: tpu7x:2x2x1
jax: 0.10.0
libtpu: 0.0.40
codegen_flags: <defaults>
</compile_context>

<pallas_src>
import functools
import math

import jax
import jax.numpy as jnp
from jax.experimental import pallas as pl
from jax.experimental.pallas import tpu as pltpu

HIDDEN = 128
OUT = 784


def _round_up(x, m):
    return (x + m - 1) // m * m


def generator_kernel(z_ref, w1_ref, b1_ref, w2_ref, b2_ref, o_ref, *, bf16_epilogue):
    # Hidden layer: z @ W1 (bf16 MXU operands, f32 accumulate), bias + ReLU in f32.
    h = jnp.dot(z_ref[...], w1_ref[...], preferred_element_type=jnp.float32)
    h = jnp.maximum(h + b1_ref[...], 0.0)
    # Output layer: h @ W2 (bf16 operands, f32 accumulate).
    o = jnp.dot(h.astype(jnp.bfloat16), w2_ref[...],
                preferred_element_type=jnp.float32)
    if bf16_epilogue:
        # v6e / v7x: bf16 VPU + EUP exist -> halve epilogue VALU/EUP work.
        ob = o.astype(jnp.bfloat16) + b2_ref[...].astype(jnp.bfloat16)
        o_ref[...] = jnp.tanh(ob)
    else:
        # v5e: no bf16 VPU/EUP -> keep the math f32, cast only at the store.
        o_ref[...] = jnp.tanh(o + b2_ref[...]).astype(o_ref.dtype)


@functools.partial(jax.jit, static_argnames=("tile_b",))
def generator_forward(z, w1, b1, w2, b2, *, tile_b=1024):
    """z: [B, latent] f32 -> [B, 784] bf16 (tanh output; consumer-friendly range)."""
    B, latent = z.shape

    kind = jax.devices()[0].device_kind.lower()
    is_v7 = "v7" in kind
    bf16_epilogue = ("v6" in kind) or is_v7  # v5e has no bf16 VPU/EUP

    # Batch tile: multiple of 16 sublane-rows (bf16 packs two rows per sublane).
    tb = min(tile_b, _round_up(B, 16))
    if is_v7:
        # Ensure >= 2 grid steps so both v7x TensorCores get work.
        tb = min(tb, max(16, _round_up(pl.cdiv(B, 2), 16)))
    b_pad = _round_up(B, tb)
    num_steps = b_pad // tb

    # Cast MXU operands to bf16 (halves weight/activation DMA bytes); pad
    # only the batch so the grid divides evenly. Biases stay f32 in HBM.
    z_p = z.astype(jnp.bfloat16)
    if b_pad != B:
        z_p = jnp.pad(z_p, ((0, b_pad - B), (0, 0)))
    w1_b = w1.astype(jnp.bfloat16)
    w2_b = w2.astype(jnp.bfloat16)
    b1_r = b1.reshape(1, HIDDEN).astype(jnp.float32)
    b2_r = b2.reshape(1, OUT).astype(jnp.float32)

    if is_v7 and num_steps >= 2:
        dims = (pltpu.CORE_PARALLEL,)   # split batch tiles across the 2 TCs
    else:
        dims = (pltpu.PARALLEL,)

    out = pl.pallas_call(
        functools.partial(generator_kernel, bf16_epilogue=bf16_epilogue),
        out_shape=jax.ShapeDtypeStruct((b_pad, OUT), jnp.bfloat16),
        grid_spec=pltpu.PrefetchScalarGridSpec(
            num_scalar_prefetch=0,
            grid=(num_steps,),
            in_specs=[
                pl.BlockSpec((tb, latent), lambda i: (i, 0)),      # z tile (pipelined)
                pl.BlockSpec((latent, HIDDEN), lambda i: (0, 0)),  # W1 resident
                pl.BlockSpec((1, HIDDEN), lambda i: (0, 0)),       # b1 resident
                pl.BlockSpec((HIDDEN, OUT), lambda i: (0, 0)),     # W2 resident
                pl.BlockSpec((1, OUT), lambda i: (0, 0)),          # b2 resident
            ],
            out_specs=pl.BlockSpec((tb, OUT), lambda i: (i, 0)),   # lane dim == full 784
        ),
        compiler_params=pltpu.CompilerParams(dimension_semantics=dims),
    )(z_p, w1_b, b1_r, w2_b, b2_r)

    if b_pad != B:
        out = out[:B]   # tiny row-only slice; no lane slice, no width copy
    return out


def init_generator_params(key, latent_dim, hidden=HIDDEN, out=OUT):
    """Deterministic init mimicking torch.nn.Linear default (U[-1/sqrt(fan_in), 1/sqrt(fan_in)])."""
    k1, k2, k3, k4 = jax.random.split(key, 4)
    bound1 = 1.0 / math.sqrt(latent_dim)
    bound2 = 1.0 / math.sqrt(hidden)
    # Stored as [in_features, out_features] (transposed vs. torch weight layout)
    w1 = jax.random.uniform(k1, (latent_dim, hidden), jnp.float32, -bound1, bound1)
    b1 = jax.random.uniform(k2, (hidden,), jnp.float32, -bound1, bound1)
    w2 = jax.random.uniform(k3, (hidden, out), jnp.float32, -bound2, bound2)
    b2 = jax.random.uniform(k4, (out,), jnp.float32, -bound2, bound2)
    return w1, b1, w2, b2


if __name__ == "__main__":
    latent_dim = 32
    batch = 8

    key = jax.random.PRNGKey(0)
    kp, kz = jax.random.split(key)
    w1, b1, w2, b2 = init_generator_params(kp, latent_dim)
    z = jax.random.normal(kz, (batch, latent_dim), jnp.float32)

    out = generator_forward(z, w1, b1, w2, b2)
    out = jax.block_until_ready(out)

    # Sanity check against pure-JAX f32 reference (bf16 MXU operands + bf16
    # output -> looser tolerance; tanh output lives in [-1, 1]).
    ref = jnp.tanh(jnp.maximum(z @ w1 + b1, 0.0) @ w2 + b2)
    assert out.shape == (batch, OUT), out.shape
    err = float(jnp.max(jnp.abs(out.astype(jnp.float32) - ref)))
    assert err < 3e-2, err

    print("KERNEL_OK")
</pallas_src>

<mosaic_0001>
module attributes {stable_mosaic.version = 11 : i64} {
  func.func @generator_kernel(%arg0: i32, %arg1: memref<16x32xbf16, #tpu.memory_space<vmem>>, %arg2: memref<32x128xbf16, #tpu.memory_space<vmem>>, %arg3: memref<1x128xf32, #tpu.memory_space<vmem>>, %arg4: memref<128x784xbf16, #tpu.memory_space<vmem>>, %arg5: memref<1x784xf32, #tpu.memory_space<vmem>>, %arg6: memref<16x784xbf16, #tpu.memory_space<vmem>>) attributes {dimension_semantics = [#tpu.dimension_semantics<parallel>], iteration_bounds = array<i64: 1>, scalar_prefetch = 0 : i64, scratch_operands = 0 : i64, tpu.core_type = #tpu.core_type<tc>, window_params = [{transform_indices = @transform_0, window_bounds = array<i64: 16, 32>}, {pipeline_mode = #tpu.pipeline_mode<synchronous>, transform_indices = @transform_1, window_bounds = array<i64: 32, 128>}, {pipeline_mode = #tpu.pipeline_mode<synchronous>, transform_indices = @transform_2, window_bounds = array<i64: 1, 128>}, {pipeline_mode = #tpu.pipeline_mode<synchronous>, transform_indices = @transform_3, window_bounds = array<i64: 128, 784>}, {pipeline_mode = #tpu.pipeline_mode<synchronous>, transform_indices = @transform_4, window_bounds = array<i64: 1, 784>}, {transform_indices = @transform_5, window_bounds = array<i64: 16, 784>}]} {
    %c0 = arith.constant 0 : index
    %c0_0 = arith.constant 0 : index
    %0 = vector.load %arg1[%c0, %c0_0] : memref<16x32xbf16, #tpu.memory_space<vmem>>, vector<16x32xbf16>
    %c0_1 = arith.constant 0 : index
    %c0_2 = arith.constant 0 : index
    %1 = vector.load %arg2[%c0_1, %c0_2] : memref<32x128xbf16, #tpu.memory_space<vmem>>, vector<32x128xbf16>
    %cst = arith.constant dense<0.000000e+00> : vector<16x128xf32>
    %2 = tpu.matmul %0, %1, %cst {dimension_numbers = #tpu.dot_dimension_numbers<[1], [0], [0], [1], [0, 0, 1, 1], [], []>} : vector<16x32xbf16>, vector<32x128xbf16>, vector<16x128xf32> -> vector<16x128xf32>
    %c0_3 = arith.constant 0 : index
    %c0_4 = arith.constant 0 : index
    %3 = vector.load %arg3[%c0_3, %c0_4] : memref<1x128xf32, #tpu.memory_space<vmem>>, vector<1x128xf32>
    %4 = vector.broadcast %3 : vector<1x128xf32> to vector<16x128xf32>
    %5 = arith.addf %2, %4 : vector<16x128xf32>
    %cst_5 = arith.constant 0.000000e+00 : f32
    %6 = vector.broadcast %cst_5 : f32 to vector<16x128xf32>
    %7 = arith.maximumf %5, %6 : vector<16x128xf32>
    %8 = arith.truncf %7 : vector<16x128xf32> to vector<16x128xbf16>
    %c0_6 = arith.constant 0 : index
    %c0_7 = arith.constant 0 : index
    %9 = vector.load %arg4[%c0_6, %c0_7] : memref<128x784xbf16, #tpu.memory_space<vmem>>, vector<128x784xbf16>
    %cst_8 = arith.constant dense<0.000000e+00> : vector<16x784xf32>
    %10 = tpu.matmul %8, %9, %cst_8 {dimension_numbers = #tpu.dot_dimension_numbers<[1], [0], [0], [1], [0, 0, 1, 1], [], []>} : vector<16x128xbf16>, vector<128x784xbf16>, vector<16x784xf32> -> vector<16x784xf32>
    %c0_9 = arith.constant 0 : index
    %c0_10 = arith.constant 0 : index
    %11 = vector.load %arg5[%c0_9, %c0_10] : memref<1x784xf32, #tpu.memory_space<vmem>>, vector<1x784xf32>
    %12 = vector.broadcast %11 : vector<1x784xf32> to vector<16x784xf32>
    %13 = arith.addf %10, %12 : vector<16x784xf32>
    %14 = math.tanh %13 : vector<16x784xf32>
    %15 = arith.truncf %14 : vector<16x784xf32> to vector<16x784xbf16>
    %c0_11 = arith.constant 0 : index
    %c0_12 = arith.constant 0 : index
    %16 = vector.load %arg6[%c0_11, %c0_12] : memref<16x784xbf16, #tpu.memory_space<vmem>>, vector<16x784xbf16>
    tpu.vector_store %arg6[%c0_11, %c0_12], %15 {strides = array<i32>} : memref<16x784xbf16, #tpu.memory_space<vmem>>, vector<16x784xbf16>,
    return
  }
  func.func @transform_0(%arg0: i32) -> (i32, i32) {
    %c0_i32 = arith.constant 0 : i32
    %c0_i32_0 = arith.constant 0 : i32
    return %arg0, %c0_i32 : i32, i32
  }
  func.func @transform_1(%arg0: i32) -> (i32, i32) {
    %c0_i32 = arith.constant 0 : i32
    %c0_i32_0 = arith.constant 0 : i32
    %c0_i32_1 = arith.constant 0 : i32
    return %c0_i32, %c0_i32_0 : i32, i32
  }
  func.func @transform_2(%arg0: i32) -> (i32, i32) {
    %c0_i32 = arith.constant 0 : i32
    %c0_i32_0 = arith.constant 0 : i32
    %c0_i32_1 = arith.constant 0 : i32
    return %c0_i32, %c0_i32_0 : i32, i32
  }
  func.func @transform_3(%arg0: i32) -> (i32, i32) {
    %c0_i32 = arith.constant 0 : i32
    %c0_i32_0 = arith.constant 0 : i32
    %c0_i32_1 = arith.constant 0 : i32
    return %c0_i32, %c0_i32_0 : i32, i32
  }
  func.func @transform_4(%arg0: i32) -> (i32, i32) {
    %c0_i32 = arith.constant 0 : i32
    %c0_i32_0 = arith.constant 0 : i32
    %c0_i32_1 = arith.constant 0 : i32
    return %c0_i32, %c0_i32_0 : i32, i32
  }
  func.func @transform_5(%arg0: i32) -> (i32, i32) {
    %c0_i32 = arith.constant 0 : i32
    %c0_i32_0 = arith.constant 0 : i32
    return %arg0, %c0_i32 : i32, i32
  }
}

</mosaic_0001>

<bundles_post_ra>
// kernel: generator_forward.1
= control target key start
LH: loop header
LB: loop body
LE: loop exit
PB: predicated region body
PF: predicated region fallthrough
CT: control target
= control target key end

     0   :  { %v960_v0 = vmov 0.0   ;;  %vm961_vm0 = vmmov 0   ;;  %vm51_vm1 = vcmask 261120   ;;  %v962_v37 = vmov 0   ;;  %s1214_s1 = inlined_call_operand.vmem [shape: bf16[32,128], index: 1, kind: input, shape index: {}]   ;;  %s1215_s0 = inlined_call_operand.vmem [shape: bf16[16,32], index: 0, kind: input, shape index: {}]   ;;  %s1216_s3 = inlined_call_operand.vmem [shape: bf16[128,784], index: 3, kind: input, shape index: {}]   ;;  %s1217_s2 = inlined_call_operand.vmem [shape: f32[1,128], index: 2, kind: input, shape index: {}]   ;;  %s1218_s4 = inlined_call_operand.vmem [shape: f32[1,784], index: 4, kind: input, shape index: {}]   ;;  %s1219_s5 = inlined_call_operand.vmem [shape: bf16[16,784], index: 5, kind: output, shape index: {}]  }
   0x1   :  { %818 = vmatprep.subr.bf16.mxu0 %v960_v0  ;;  %v849_v1 = vld [vmem:[%s1214_s1] sm:$0xff]   ;;  %822 = vmatprep.mubr.msk.bf16.mxu0 %vm961_vm0, %v960_v0  ;;  %v850_v2 = vld [vmem:[%s1214_s1 + $0x8] sm:$0xff]   ;;  %v858_v8 = vld [vmem:[%s1216_s3 + $0x3c] ss:$28 sps:$4 sm:$0xff]   ;;  %vm719_vm2 = vcmask 125952  }
   0x2   :  { %819 = vmatpush3.bf16.msra.mxu0 %v849_v1  ;;  %v851_v3 = vld [vmem:[%s1215_s0] sm:$0xff]   ;;  %v856_v6 = vld [vmem:[%s1216_s3 + $0xc] ss:$28 sps:$4 sm:$0xff]   ;;  %v863_v10 = vld [vmem:[%s1216_s3 + $0x38] ss:$28 sps:$4 sm:$0xff]   ;;  %520 = vmatprep.mubr.bf16.mxu1 %v962_v37 }
   0x3   :  { %820 = vmatprep.subr.bf16.mxu0 %v960_v0  ;;  %v852_v4 = vld [vmem:[%s1216_s3 + $0x4] ss:$28 sps:$4 sm:$0xff]   ;;  %v864_v11 = vld [vmem:[%s1216_s3 + $0x74] ss:$28 sps:$4 sm:$0xff]   ;;  %v868_v13 = vld [vmem:[%s1216_s3 + $0x7c] ss:$28 sps:$4 sm:$0xff]  }
   0x4   :  { %v854_v5 = vld [vmem:[%s1216_s3 + $0x8] ss:$28 sps:$4 sm:$0xff]   ;;  %488 = vmatprep.subr.bf16.mxu1 %v852_v4  ;;  %v857_v7 = vld [vmem:[%s1216_s3] ss:$28 sps:$4 sm:$0xff]   ;;  %v869_v14 = vld [vmem:[%s1216_s3 + $0x70] ss:$28 sps:$4 sm:$0xff]  }
   0x5   :  { %489 = vmatpush1.bf16.msra.mxu1 %v857_v7  ;;  %v862_v9 = vld [vmem:[%s1216_s3 + $0x44] ss:$28 sps:$4 sm:$0xff]   ;;  %v870_v15 = vld [vmem:[%s1216_s3 + $0xac] ss:$28 sps:$4 sm:$0xff]   ;;  %v866_v16 = vld [vmem:[%s1216_s3 + $0x78] ss:$28 sps:$4 sm:$0xff]  }
   0x6   :  { %821 = vmatpush3.bf16.msra.mxu0 %v850_v2  ;;  %490 = vmatprep.subr.bf16.mxu1 %v858_v8  ;;  %v860_v12 = vld [vmem:[%s1216_s3 + $0x40] ss:$28 sps:$4 sm:$0xff]   ;;  %v874_v17 = vld [vmem:[%s1216_s3 + $0xb4] ss:$28 sps:$4 sm:$0xff]   ;;  %v875_v18 = vld [vmem:[%s1216_s3 + $0xa8] ss:$28 sps:$4 sm:$0xff]   ;;  %v165_v8 = vlaneseq }
   0x7   :  { %531 = vmatprep.subr.bf16.mxu0 %v856_v6  ;;  %v876_v19 = vld [vmem:[%s1216_s3 + $0xe4] ss:$28 sps:$4 sm:$0xff]   ;;  %v872_v20 = vld [vmem:[%s1216_s3 + $0xb0] ss:$28 sps:$4 sm:$0xff]   ;;  %v882_v23 = vld [vmem:[%s1216_s3 + $0x11c] ss:$28 sps:$4 sm:$0xff]  }
   0x8   :  { %v880_v21 = vld [vmem:[%s1216_s3 + $0xec] ss:$28 sps:$4 sm:$0xff]   ;;  %v881_v22 = vld [vmem:[%s1216_s3 + $0xe0] ss:$28 sps:$4 sm:$0xff]   ;;  %v887_v26 = vld [vmem:[%s1216_s3 + $0x118] ss:$28 sps:$4 sm:$0xff]  }
   0x9   :  { %823 = vmatmul.mubr.msk.bf16.vlgmr.msra.gmra.mrb[0].mxu0 %vm51_vm1, %v851_v3  ;;  %491 = vmatpush1.bf16.msra.mxu1 %v863_v10  ;;  %v878_v24 = vld [vmem:[%s1216_s3 + $0xe8] ss:$28 sps:$4 sm:$0xff]   ;;  %v884_v27 = vld [vmem:[%s1216_s3 + $0x120] ss:$28 sps:$4 sm:$0xff]   ;;  %v888_v28 = vld [vmem:[%s1216_s3 + $0x154] ss:$28 sps:$4 sm:$0xff]  }
   0xa   :  { %532 = vmatpush1.bf16.msra.mxu0 %v854_v5  ;;  %492 = vmatprep.subr.bf16.mxu1 %v864_v11  ;;  %v886_v25 = vld [vmem:[%s1216_s3 + $0x124] ss:$28 sps:$4 sm:$0xff]   ;;  %v892_v29 = vld [vmem:[%s1216_s3 + $0x15c] ss:$28 sps:$4 sm:$0xff]   ;;  %v893_v31 = vld [vmem:[%s1216_s3 + $0x150] ss:$28 sps:$4 sm:$0xff]  }
   0xb   :  { %533 = vmatprep.subr.bf16.mxu0 %v862_v9  ;;  %v890_v30 = vld [vmem:[%s1216_s3 + $0x158] ss:$28 sps:$4 sm:$0xff]   ;;  %v894_v32 = vld [vmem:[%s1216_s3 + $0x18c] ss:$28 sps:$4 sm:$0xff]   ;;  %563 = vmatprep.mubr.bf16.mxu0 %v962_v37  ;;  %v729_v38 = vld [vmem:[%s1217_s2] ss:$0 sm:$0xff] }
   0xc   :  { %v898_v33 = vld [vmem:[%s1216_s3 + $0x194] ss:$28 sps:$4 sm:$0xff]   ;;  %v899_v35 = vld [vmem:[%s1216_s3 + $0x188] ss:$28 sps:$4 sm:$0xff]   ;;  %v908_v54 = vld [vmem:[%s1216_s3 + $0x80] ss:$28 sps:$4 sm:$0xff]  }
   0xd   :  { %493 = vmatpush1.bf16.msra.mxu1 %v869_v14  ;;  %v896_v34 = vld [vmem:[%s1216_s3 + $0x190] ss:$28 sps:$4 sm:$0xff]   ;;  %v903_v48 = vld [vmem:[%s1216_s3 + $0x18] ss:$28 sps:$4 sm:$0xff]   ;;  %v904_v51 = vld [vmem:[%s1216_s3 + $0x48] ss:$28 sps:$4 sm:$0xff]  }
   0xe   :  { %534 = vmatpush1.bf16.msra.mxu0 %v860_v12  ;;  %494 = vmatprep.subr.bf16.mxu1 %v870_v15  ;;  %v902_v36 = vld [vmem:[%s1216_s3 + $0x14] ss:$28 sps:$4 sm:$0xff]   ;;  %v906_v50 = vld [vmem:[%s1216_s3 + $0x4c] ss:$28 sps:$4 sm:$0xff]   ;;  %v910_v53 = vld [vmem:[%s1216_s3 + $0x84] ss:$28 sps:$4 sm:$0xff]  }
   0xf   :  { %535 = vmatprep.subr.bf16.mxu0 %v868_v13  ;;  %v900_v47 = vld [vmem:[%s1216_s3 + $0x10] ss:$28 sps:$4 sm:$0xff]   ;;  %v911_v55 = vld [vmem:[%s1216_s3 + $0x88] ss:$28 sps:$4 sm:$0xff]   ;;  %v914_v56 = vld [vmem:[%s1216_s3 + $0xbc] ss:$28 sps:$4 sm:$0xff]  }
  0x10   :  { %v907_v52 = vld [vmem:[%s1216_s3 + $0x50] ss:$28 sps:$4 sm:$0xff]   ;;  %v912_v57 = vld [vmem:[%s1216_s3 + $0xb8] ss:$28 sps:$4 sm:$0xff]   ;;  %v915_v58 = vld [vmem:[%s1216_s3 + $0xc0] ss:$28 sps:$4 sm:$0xff]  }
  0x11   :  { %495 = vmatpush1.bf16.msra.mxu1 %v875_v18  ;;  %v918_v59 = vld [vmem:[%s1216_s3 + $0xf4] ss:$28 sps:$4 sm:$0xff]   ;;  %v922_v62 = vld [vmem:[%s1216_s3 + $0x12c] ss:$28 sps:$4 sm:$0xff]   ;;  %v926_v2 = vld [vmem:[%s1216_s3 + $0x164] ss:$28 sps:$4 sm:$0xff]  }
  0x12   :  { %536 = vmatpush1.bf16.msra.mxu0 %v866_v16  ;;  %496 = vmatprep.subr.bf16.mxu1 %v876_v19  ;;  %v916_v60 = vld [vmem:[%s1216_s3 + $0xf0] ss:$28 sps:$4 sm:$0xff]   ;;  %v919_v61 = vld [vmem:[%s1216_s3 + $0xf8] ss:$28 sps:$4 sm:$0xff]   ;;  %v920_v63 = vld [vmem:[%s1216_s3 + $0x128] ss:$28 sps:$4 sm:$0xff]  }
  0x13   :  { %537 = vmatprep.subr.bf16.mxu0 %v874_v17  ;;  %v923_v1 = vld [vmem:[%s1216_s3 + $0x130] ss:$28 sps:$4 sm:$0xff]   ;;  %v924_v3 = vld [vmem:[%s1216_s3 + $0x160] ss:$28 sps:$4 sm:$0xff]   ;;  %v927_v4 = vld [vmem:[%s1216_s3 + $0x168] ss:$28 sps:$4 sm:$0xff]  }
  0x14   :  { %v930_v5 = vld [vmem:[%s1216_s3 + $0x19c] ss:$28 sps:$4 sm:$0xff]   ;;  %v166_v9 = vshrl.u32 %v165_v8, 7  ;;  %v163_v12 = vld [vmem:[%s1218_s4] sm:$0x7f] }
  0x15   :  { %497 = vmatpush1.bf16.msra.mxu1 %v881_v22  ;;  %v928_v6 = vld [vmem:[%s1216_s3 + $0x198] ss:$28 sps:$4 sm:$0xff]   ;;  %v931_v7 = vld [vmem:[%s1216_s3 + $0x1a0] ss:$28 sps:$4 sm:$0xff]  }
  0x16   :  { %538 = vmatpush1.bf16.msra.mxu0 %v872_v20  ;;  %498 = vmatprep.subr.bf16.mxu1 %v882_v23  ;;  %v167_v10 = vsub.s32 0, %v166_v9  ;;  %v175_v11 = vsub.s32 2, %v166_v9  ;;  %v171_v13 = vsub.s32 1, %v166_v9  ;;  %v179_v14 = vsub.s32 3, %v166_v9 }
  0x17   :  { %539 = vmatprep.subr.bf16.mxu0 %v880_v21 }
  0x18   :  { %v168_v15 = vrot.slane %v163_v12, %v167_v10  ;;  %v176_v16 = vrot.slane %v163_v12, %v175_v11  ;;  %v172_v17 = vrot.slane %v163_v12, %v171_v13  ;;  %v180_v18 = vrot.slane %v163_v12, %v179_v14 }
  0x19   :  { %499 = vmatpush1.bf16.msra.mxu1 %v887_v26 }
  0x1a   :  { %540 = vmatpush1.bf16.msra.mxu0 %v878_v24  ;;  %500 = vmatprep.subr.bf16.mxu1 %v888_v28 }
  0x1b   :  { %541 = vmatprep.subr.bf16.mxu0 %v886_v25 }
  0x1d   :  { %501 = vmatpush1.bf16.msra.mxu1 %v893_v31 }
  0x1e   :  { %542 = vmatpush1.bf16.msra.mxu0 %v884_v27  ;;  %502 = vmatprep.subr.bf16.mxu1 %v894_v32 }
  0x1f   :  { %543 = vmatprep.subr.bf16.mxu0 %v892_v29 }
  0x21   :  { %503 = vmatpush1.bf16.msra.mxu1 %v899_v35 }
  0x22   :  { %544 = vmatpush1.bf16.msra.mxu0 %v890_v30  ;;  %574 = vmatprep.subr.bf16.mxu1 %v902_v36 }
  0x23   :  { %545 = vmatprep.subr.bf16.mxu0 %v898_v33 }
  0x26   :  { %546 = vmatpush1.bf16.msra.mxu0 %v896_v34 }
  0x27   :  { %826 = vmatprep.subr.bf16.mxu0 %v960_v0 }
  0xdc   :  { %v89_v39 = vpop.f32.mrb[0].mxu0 }
  0xdd   :  { %v90_v40 = vadd.f32 %v729_v38, %v89_v39  ;;  %v824_v41 = vpop.f32.mrb[1].mxu0 }
  0xde   :  { %v92_v42 = vpop.f32.mrb[2].mxu0 }
  0xdf   :  { %v93_v43 = vadd.f32 %v729_v38, %v92_v42  ;;  %v825_v44 = vpop.f32.mrb[3].mxu0  ;;  %v96_v45 = vmax.f32 %v90_v40, 0.0 }
  0xe1   :  { %v97_v46 = vmax.f32 %v93_v43, 0.0 }
  0xe3   :  { %v98_v49 = vpack.c.bf16 %v97_v46, %v96_v45  ;;  %v183_v46 = vsub.s32 4, %v166_v9 }
  0xe5   :  { %521 = vmatmul.mubr.bf16.vlgmr.msra.gmra.mrb[0].mxu1 %v98_v49  ;;  %564 = vmatmul.mubr.bf16.vlgmr.msra.gmra.mrb[4].mxu0 %v98_v49 }
  0xe6   :  { %575 = vmatpush1.bf16.msra.mxu1 %v900_v47  ;;  %827 = vmatpush3.bf16.msra.mxu0 %v903_v48  ;;  %v191_v47 = vsub.s32 6, %v166_v9  ;;  %v187_v48 = vsub.s32 5, %v166_v9 }
  0xe7   :  { %576 = vmatprep.subr.bf16.mxu1 %v906_v50  ;;  %828 = vmatprep.subr.bf16.mxu0 %v960_v0 }
  0xe8   :  { %606 = vmatprep.mubr.bf16.mxu1 %v962_v37  ;;  %842 = vmatprep.mubr.msk.bf16.mxu0 %vm961_vm0, %v960_v0  ;;  %v192_v50 = vrot.slane %v163_v12, %v191_v47 }
  0xea   :  { %577 = vmatpush1.bf16.msra.mxu1 %v904_v51  ;;  %829 = vmatpush3.bf16.msra.mxu0 %v907_v52  ;;  %v188_v51 = vrot.slane %v163_v12, %v187_v48 }
  0xeb   :  { %578 = vmatprep.subr.bf16.mxu1 %v910_v53  ;;  %830 = vmatprep.subr.bf16.mxu0 %v960_v0 }
  0xee   :  { %579 = vmatpush1.bf16.msra.mxu1 %v908_v54  ;;  %831 = vmatpush3.bf16.msra.mxu0 %v911_v55 }
  0xef   :  { %580 = vmatprep.subr.bf16.mxu1 %v914_v56  ;;  %832 = vmatprep.subr.bf16.mxu0 %v960_v0 }
  0xf2   :  { %581 = vmatpush1.bf16.msra.mxu1 %v912_v57  ;;  %833 = vmatpush3.bf16.msra.mxu0 %v915_v58 }
  0xf3   :  { %582 = vmatprep.subr.bf16.mxu1 %v918_v59  ;;  %834 = vmatprep.subr.bf16.mxu0 %v960_v0 }
  0xf6   :  { %583 = vmatpush1.bf16.msra.mxu1 %v916_v60  ;;  %835 = vmatpush3.bf16.msra.mxu0 %v919_v61 }
  0xf7   :  { %584 = vmatprep.subr.bf16.mxu1 %v922_v62  ;;  %836 = vmatprep.subr.bf16.mxu0 %v960_v0 }
  0xfa   :  { %585 = vmatpush1.bf16.msra.mxu1 %v920_v63  ;;  %837 = vmatpush3.bf16.msra.mxu0 %v923_v1 }
  0xfb   :  { %586 = vmatprep.subr.bf16.mxu1 %v926_v2  ;;  %838 = vmatprep.subr.bf16.mxu0 %v960_v0 }
  0xfe   :  { %587 = vmatpush1.bf16.msra.mxu1 %v924_v3  ;;  %839 = vmatpush3.bf16.msra.mxu0 %v927_v4 }
  0xff   :  { %588 = vmatprep.subr.bf16.mxu1 %v930_v5  ;;  %840 = vmatprep.subr.bf16.mxu0 %v960_v0 }
 0x102   :  { %589 = vmatpush1.bf16.msra.mxu1 %v928_v6  ;;  %841 = vmatpush3.bf16.msra.mxu0 %v931_v7 }
 0x105   :  { %607 = vmatmul.mubr.bf16.vlgmr.msra.gmra.mrb[4].mxu1 %v98_v49  ;;  %843 = vmatmul.mubr.bf16.vlgmr.msra.gmra.mrb[8].mxu0 %v98_v49  ;;  %v184_v49 = vrot.slane %v163_v12, %v183_v46 }
 0x1b8   :  { %v522_v19 = vpop.f32.mrb[0].mxu1  ;;  %v565_v0 = vpop.f32.mrb[4].mxu0 }
 0x1b9   :  { %v523_v20 = vadd.f32 %v522_v19, %v168_v15  ;;  %v566_v21 = vadd.f32 %v565_v0, %v176_v16  ;;  %v524_v22 = vpop.f32.mrb[1].mxu1  ;;  %v567_v23 = vpop.f32.mrb[5].mxu0 }
 0x1ba   :  { %v525_v24 = vadd.f32 %v524_v22, %v172_v17  ;;  %v568_v25 = vadd.f32 %v567_v23, %v180_v18  ;;  %v526_v26 = vpop.f32.mrb[2].mxu1  ;;  %v569_v27 = vpop.f32.mrb[6].mxu0 }
 0x1bb   :  { %932 = vtanh.f32 %v523_v20  ;;  %v527_v28 = vadd.f32 %v526_v26, %v168_v15  ;;  %v528_v29 = vpop.f32.mrb[3].mxu1  ;;  %v571_v30 = vpop.f32.mrb[7].mxu0  ;;  %v570_v31 = vadd.f32 %v569_v27, %v176_v16 }
 0x1bc   :  { %934 = vtanh.f32 %v566_v21  ;;  %v529_v32 = vadd.f32 %v528_v29, %v172_v17  ;;  %v572_v33 = vadd.f32 %v571_v30, %v180_v18 }
 0x1bd   :  { %936 = vtanh.f32 %v525_v24 }
 0x1be   :  { %938 = vtanh.f32 %v568_v25 }
 0x1bf   :  { %940 = vtanh.f32 %v527_v28 }
 0x1c0   :  { %942 = vtanh.f32 %v570_v31 }
 0x1c1   :  { %944 = vtanh.f32 %v529_v32 }
 0x1c2   :  { %946 = vtanh.f32 %v572_v33 }
 0x1c5   :  { %v933_v34 = vpop.eup %932 }
 0x1c6   :  { %v935_v35 = vpop.eup %934 }
 0x1c7   :  { %v937_v36 = vpop.eup %936 }
 0x1c8   :  { %v939_v37 = vpop.eup %938  ;;  %v798_v38 = vpack.c.bf16 %v937_v36, %v933_v34 }
 0x1c9   :  { %v941_v39 = vpop.eup %940  ;;  %v799_v40 = vpack.c.bf16 %v939_v37, %v935_v35 }
 0x1ca   :  { %v943_v41 = vpop.eup %942  ;;  %716 = vst [vmem:[%s1219_s5] sm:$0xff] %v798_v38 }
 0x1cb   :  { %v945_v42 = vpop.eup %944  ;;  %717 = vst [vmem:[%s1219_s5 + $0x8] sm:$0xff] %v799_v40 }
 0x1cc   :  { %v947_v43 = vpop.eup %946  ;;  %v802_v44 = vpack.c.bf16 %v945_v42, %v941_v39 }
 0x1cd   :  { %v803_v45 = vpack.c.bf16 %v947_v43, %v943_v41 }
 0x1ce   :  { %721 = vst [vmem:[%s1219_s5 + $0x1c] sm:$0xff] %v802_v44 }
 0x1cf   :  { %722 = vst [vmem:[%s1219_s5 + $0x24] sm:$0xff] %v803_v45 }
 0x1d8   :  { %v608_v52 = vpop.f32.mrb[4].mxu1  ;;  %v651_v53 = vpop.f32.mrb[8].mxu0 }
 0x1d9   :  { %v609_v54 = vadd.f32 %v608_v52, %v184_v49  ;;  %v652_v55 = vadd.f32 %v651_v53, %v192_v50  ;;  %v610_v56 = vpop.f32.mrb[5].mxu1  ;;  %v844_v57 = vpop.f32.mrb[9].mxu0 }
 0x1da   :  { %v611_v58 = vadd.f32 %v610_v56, %v188_v51  ;;  %v612_v59 = vpop.f32.mrb[6].mxu1  ;;  %v654_v60 = vpop.f32.mrb[10].mxu0 }
 0x1db   :  { %948 = vtanh.f32 %v609_v54  ;;  %v613_v61 = vadd.f32 %v612_v59, %v184_v49  ;;  %v655_v62 = vadd.f32 %v654_v60, %v192_v50  ;;  %v614_v63 = vpop.f32.mrb[7].mxu1  ;;  %v845_v1 = vpop.f32.mrb[11].mxu0 }
 0x1dc   :  { %950 = vtanh.f32 %v652_v55  ;;  %v615_v2 = vadd.f32 %v614_v63, %v188_v51 }
 0x1dd   :  { %952 = vtanh.f32 %v611_v58 }
 0x1de   :  { %954 = vtanh.f32 %v613_v61 }
 0x1df   :  { %956 = vtanh.f32 %v655_v62 }
 0x1e0   :  { %958 = vtanh.f32 %v615_v2 }
 0x1e5   :  { %v949_v3 = vpop.eup %948 }
 0x1e6   :  { %v951_v4 = vpop.eup %950 }
 0x1e7   :  { %v953_v5 = vpop.eup %952  ;;  %v801_v6 = vpack.c.bf16 %v951_v4, %v951_v4 }
 0x1e8   :  { %v955_v7 = vpop.eup %954  ;;  %v800_v8 = vpack.c.bf16 %v953_v5, %v949_v3 }
 0x1e9   :  { %v957_v9 = vpop.eup %956  ;;  %720 = vst.msk [vmem:[%s1219_s5 + $0x18] sm:$0xf] %vm719_vm2, %v801_v6 }
 0x1ea   :  { %v959_v10 = vpop.eup %958  ;;  %718 = vst [vmem:[%s1219_s5 + $0x10] sm:$0xff] %v800_v8  ;;  %v805_v11 = vpack.c.bf16 %v957_v9, %v957_v9 }
 0x1eb   :  { %v804_v12 = vpack.c.bf16 %v959_v10, %v955_v7 }
 0x1ec   :  { %724 = vst.msk [vmem:[%s1219_s5 + $0x34] sm:$0xf] %vm719_vm2, %v805_v11 }
 0x1ed   :  { %723 = vst [vmem:[%s1219_s5 + $0x2c] sm:$0xff] %v804_v12 }

</bundles_post_ra>
